<compile_context>
chip_gen: v7x
topology: tpu7x:2x2x1
jax: 0.10.0
libtpu: 0.0.40
codegen_flags: <defaults>
</compile_context>

<pallas_src>
import functools

import jax
import jax.numpy as jnp
from jax.experimental import pallas as pl
from jax.experimental.pallas import tpu as pltpu


def _round_up(v, m):
    return (v + m - 1) // m * m


def _is_v7x():
    """Best-effort chip detection (trace-time Python; falls back to False)."""
    try:
        kind = jax.devices()[0].device_kind.lower()
    except Exception:
        return False
    return "v7" in kind


def _encoder_kernel(x_ref, w1_ref, b1_ref, w2_ref, b2_ref, o_ref):
    # Two MXU matmuls with f32 accumulation; bias + ReLU in f32 on the VPU.
    x = x_ref[...]
    h = jnp.dot(x, w1_ref[...], preferred_element_type=jnp.float32)
    h = jnp.maximum(h + b1_ref[...].astype(jnp.float32), 0.0)
    # Cast hidden activations to the weight dtype (bf16 weights -> bf16 MXU
    # path; f32 weights -> no-op); the dot still accumulates in f32.
    y = jnp.dot(h.astype(w2_ref.dtype), w2_ref[...],
                preferred_element_type=jnp.float32)
    y = jnp.maximum(y + b2_ref[...].astype(jnp.float32), 0.0)
    o_ref[...] = y.astype(o_ref.dtype)


@functools.partial(jax.jit, static_argnames=("tile_m", "vmem_budget_bytes"))
def particle_encoder(x, w1, b1, w2, b2, *, tile_m=None, vmem_budget_bytes=None):
    """x: [n_particles, input_size] -> [n_particles, output_size]."""
    n, d_in = x.shape
    d_hid = w1.shape[1]
    d_out = w2.shape[1]
    assert w1.shape[0] == d_in and w2.shape[0] == d_hid
    b1 = b1.reshape(1, d_hid)
    b2 = b2.reshape(1, d_out)

    is_v7 = _is_v7x()

    # Only the resident, read-once weights get lane-dense padding (hidden dim
    # to a multiple of 128); x and the output stream at their true widths.
    d_hid_p = _round_up(d_hid, 128)
    w1p = jnp.pad(w1, ((0, 0), (0, d_hid_p - d_hid)))
    b1p = jnp.pad(b1, ((0, 0), (0, d_hid_p - d_hid)))
    w2p = jnp.pad(w2, ((0, d_hid_p - d_hid), (0, 0)))
    b2p = b2

    x_isz = jnp.dtype(x.dtype).itemsize
    w_isz = jnp.dtype(w1.dtype).itemsize
    out_isz = x_isz  # output dtype follows x dtype
    weight_bytes = (d_in * d_hid_p + d_hid_p + d_hid_p * d_out + d_out) * w_isz
    weight_copies = 1 if is_v7 else 2  # single-buffered weights on v7x

    if vmem_budget_bytes is None:
        vmem_budget_bytes = (40 << 20) if is_v7 else (64 << 20)
    vmem_cap = (56 << 20) if is_v7 else (100 << 20)  # leave physical headroom

    def _tile_bytes(m):
        # double-buffered streamed x / out tiles
        stream = 2 * m * (d_in * x_isz + d_out * out_isz)
        # in-kernel f32 intermediates (h and pre-cast y)
        inter = m * (d_hid_p + d_out) * 4
        if w_isz < 4:
            inter += m * d_hid_p * w_isz  # cast copy of h for the 2nd matmul
        return weight_copies * weight_bytes + stream + inter

    n8 = _round_up(max(n, 1), 8)
    if tile_m is None:
        caps = ((2048, 1024, 512, 256, 128, 64, 32, 16, 8) if is_v7 else
                (8192, 4096, 2048, 1024, 512, 256, 128, 64, 32, 16, 8))
        cands = []
        for c in caps:
            c = min(c, n8)            # never exceed the (8-rounded) row count
            if c not in cands:
                cands.append(c)       # stays descending

        def _megacore_ok(m):
            steps = -(-n // m)
            return steps >= 8 or steps % 2 == 0

        tile_m = cands[-1]
        passes = (True, False) if is_v7 else (False,)
        for require_balanced in passes:
            found = False
            for c in cands:
                if _tile_bytes(c) > vmem_budget_bytes:
                    continue
                if require_balanced and not _megacore_ok(c):
                    continue
                tile_m = c
                found = True
                break
            if found:
                break

    vmem_limit = int(min(max(_tile_bytes(tile_m) + (8 << 20), 16 << 20),
                         vmem_cap))

    grid = (pl.cdiv(n, tile_m),)  # ragged last block: Pallas masks its stores

    def _resident_spec(shape):
        # Constant-index (resident) blocks: on v7x single-buffer them to save
        # one VMEM copy each (only 64 MiB physical VMEM per TC there); on
        # v5e/v6e keep the default double-buffering (VMEM is plentiful).
        if is_v7:
            return pl.BlockSpec(shape, lambda i: (0, 0),
                                pipeline_mode=pl.Buffered(1))
        return pl.BlockSpec(shape, lambda i: (0, 0))

    cost = pl.CostEstimate(
        flops=2 * n * (d_in * d_hid + d_hid * d_out),
        transcendentals=0,
        bytes_accessed=(n * d_in * x_isz + weight_bytes + n * d_out * out_isz),
    )

    return pl.pallas_call(
        _encoder_kernel,
        out_shape=jax.ShapeDtypeStruct((n, d_out), x.dtype),
        grid_spec=pltpu.PrefetchScalarGridSpec(
            num_scalar_prefetch=0,
            grid=grid,
            in_specs=[
                pl.BlockSpec((tile_m, d_in), lambda i: (i, 0)),  # x (unpadded)
                _resident_spec((d_in, d_hid_p)),                 # W1 (resident)
                _resident_spec((1, d_hid_p)),                    # b1
                _resident_spec((d_hid_p, d_out)),                # W2 (resident)
                _resident_spec((1, d_out)),                      # b2
            ],
            out_specs=pl.BlockSpec((tile_m, d_out), lambda i: (i, 0)),
        ),
        compiler_params=pltpu.CompilerParams(
            dimension_semantics=("parallel",),
            vmem_limit_bytes=vmem_limit,
        ),
        cost_estimate=cost,
    )(x, w1p, b1p, w2p, b2p)


def init_params(key, input_size, hidden_size, output_size, dtype=jnp.float32):
    """Deterministic init mimicking torch.nn.Linear defaults U(-1/sqrt(fan_in), +)."""
    k1, k2, k3, k4 = jax.random.split(key, 4)
    bound1 = 1.0 / (input_size ** 0.5)
    bound2 = 1.0 / (hidden_size ** 0.5)
    # Stored as [in_features, out_features] (transpose of PyTorch layout).
    w1 = jax.random.uniform(k1, (input_size, hidden_size), dtype, -bound1, bound1)
    b1 = jax.random.uniform(k2, (1, hidden_size), dtype, -bound1, bound1)
    w2 = jax.random.uniform(k3, (hidden_size, output_size), dtype, -bound2, bound2)
    b2 = jax.random.uniform(k4, (1, output_size), dtype, -bound2, bound2)
    return w1, b1, w2, b2


def reference(x, w1, b1, w2, b2):
    h = jnp.maximum(x @ w1 + b1, 0.0)
    return jnp.maximum(h @ w2 + b2, 0.0)


if __name__ == "__main__":
    key = jax.random.PRNGKey(0)
    kx, kp = jax.random.split(key)

    # Small, deliberately non-aligned shapes: n=300 rows, d_in=30 (streamed
    # unpadded), hidden=128, d_out=64 (written at true width).
    n_particles = 300
    input_size = 30
    hidden_size = 128
    output_size = 64

    x = jax.random.normal(kx, (n_particles, input_size), jnp.float32)
    w1, b1, w2, b2 = init_params(kp, input_size, hidden_size, output_size)

    # f32 path (exact-ish vs. reference).
    out = jax.block_until_ready(particle_encoder(x, w1, b1, w2, b2))
    ref = reference(x, w1, b1, w2, b2)
    assert out.shape == (n_particles, output_size)
    assert jnp.allclose(out, ref, atol=1e-5, rtol=1e-5), "f32 mismatch vs reference"

    # bf16 streaming path (recommended on v5e AND v6e/v7x): halves the
    # mem-bound x/out HBM stream, native bf16 MXU; f32 accumulation and f32
    # bias/ReLU inside the kernel keep v5e's lack of bf16 VPU/EUP irrelevant.
    xb = x.astype(jnp.bfloat16)
    w1b, b1b, w2b, b2b = (p.astype(jnp.bfloat16) for p in (w1, b1, w2, b2))
    out_bf16 = jax.block_until_ready(particle_encoder(xb, w1b, b1b, w2b, b2b))
    assert out_bf16.shape == (n_particles, output_size)
    assert jnp.allclose(out_bf16.astype(jnp.float32), ref, atol=5e-2, rtol=5e-2), \
        "bf16 mismatch vs reference"

    print("KERNEL_OK")
</pallas_src>

<mosaic_0001>
module attributes {stable_mosaic.version = 11 : i64} {
  func.func @_encoder_kernel(%arg0: i32, %arg1: memref<304x30xf32, #tpu.memory_space<vmem>>, %arg2: memref<30x128xf32, #tpu.memory_space<vmem>>, %arg3: memref<1x128xf32, #tpu.memory_space<vmem>>, %arg4: memref<128x64xf32, #tpu.memory_space<vmem>>, %arg5: memref<1x64xf32, #tpu.memory_space<vmem>>, %arg6: memref<304x64xf32, #tpu.memory_space<vmem>>) attributes {dimension_semantics = [#tpu.dimension_semantics<parallel>], iteration_bounds = array<i64: 1>, scalar_prefetch = 0 : i64, scratch_operands = 0 : i64, tpu.core_type = #tpu.core_type<tc>, window_params = [{transform_indices = @transform_0, window_bounds = array<i64: 304, 30>}, {pipeline_mode = #tpu.pipeline_mode<synchronous>, transform_indices = @transform_1, window_bounds = array<i64: 30, 128>}, {pipeline_mode = #tpu.pipeline_mode<synchronous>, transform_indices = @transform_2, window_bounds = array<i64: 1, 128>}, {pipeline_mode = #tpu.pipeline_mode<synchronous>, transform_indices = @transform_3, window_bounds = array<i64: 128, 64>}, {pipeline_mode = #tpu.pipeline_mode<synchronous>, transform_indices = @transform_4, window_bounds = array<i64: 1, 64>}, {transform_indices = @transform_5, window_bounds = array<i64: 304, 64>}]} {
    %c0 = arith.constant 0 : index
    %c0_0 = arith.constant 0 : index
    %0 = vector.load %arg1[%c0, %c0_0] : memref<304x30xf32, #tpu.memory_space<vmem>>, vector<304x30xf32>
    %c0_1 = arith.constant 0 : index
    %c0_2 = arith.constant 0 : index
    %1 = vector.load %arg2[%c0_1, %c0_2] : memref<30x128xf32, #tpu.memory_space<vmem>>, vector<30x128xf32>
    %cst = arith.constant dense<0.000000e+00> : vector<304x128xf32>
    %2 = tpu.matmul %0, %1, %cst {dimension_numbers = #tpu.dot_dimension_numbers<[1], [0], [0], [1], [0, 0, 1, 1], [], []>} : vector<304x30xf32>, vector<30x128xf32>, vector<304x128xf32> -> vector<304x128xf32>
    %c0_3 = arith.constant 0 : index
    %c0_4 = arith.constant 0 : index
    %3 = vector.load %arg3[%c0_3, %c0_4] : memref<1x128xf32, #tpu.memory_space<vmem>>, vector<1x128xf32>
    %4 = vector.broadcast %3 : vector<1x128xf32> to vector<304x128xf32>
    %5 = arith.addf %2, %4 : vector<304x128xf32>
    %cst_5 = arith.constant 0.000000e+00 : f32
    %6 = vector.broadcast %cst_5 : f32 to vector<304x128xf32>
    %7 = arith.maximumf %5, %6 : vector<304x128xf32>
    %c0_6 = arith.constant 0 : index
    %c0_7 = arith.constant 0 : index
    %8 = vector.load %arg4[%c0_6, %c0_7] : memref<128x64xf32, #tpu.memory_space<vmem>>, vector<128x64xf32>
    %cst_8 = arith.constant dense<0.000000e+00> : vector<304x64xf32>
    %9 = tpu.matmul %7, %8, %cst_8 {dimension_numbers = #tpu.dot_dimension_numbers<[1], [0], [0], [1], [0, 0, 1, 1], [], []>} : vector<304x128xf32>, vector<128x64xf32>, vector<304x64xf32> -> vector<304x64xf32>
    %c0_9 = arith.constant 0 : index
    %c0_10 = arith.constant 0 : index
    %10 = vector.load %arg5[%c0_9, %c0_10] : memref<1x64xf32, #tpu.memory_space<vmem>>, vector<1x64xf32>
    %11 = vector.broadcast %10 : vector<1x64xf32> to vector<304x64xf32>
    %12 = arith.addf %9, %11 : vector<304x64xf32>
    %cst_11 = arith.constant 0.000000e+00 : f32
    %13 = vector.broadcast %cst_11 : f32 to vector<304x64xf32>
    %14 = arith.maximumf %12, %13 : vector<304x64xf32>
    %c0_12 = arith.constant 0 : index
    %c0_13 = arith.constant 0 : index
    %15 = vector.load %arg6[%c0_12, %c0_13] : memref<304x64xf32, #tpu.memory_space<vmem>>, vector<304x64xf32>
    tpu.vector_store %arg6[%c0_12, %c0_13], %14 {strides = array<i32>} : memref<304x64xf32, #tpu.memory_space<vmem>>, vector<304x64xf32>,
    return
  }
  func.func @transform_0(%arg0: i32) -> (i32, i32) {
    %c0_i32 = arith.constant 0 : i32
    %c0_i32_0 = arith.constant 0 : i32
    return %arg0, %c0_i32 : i32, i32
  }
  func.func @transform_1(%arg0: i32) -> (i32, i32) {
    %c0_i32 = arith.constant 0 : i32
    %c0_i32_0 = arith.constant 0 : i32
    %c0_i32_1 = arith.constant 0 : i32
    return %c0_i32, %c0_i32_0 : i32, i32
  }
  func.func @transform_2(%arg0: i32) -> (i32, i32) {
    %c0_i32 = arith.constant 0 : i32
    %c0_i32_0 = arith.constant 0 : i32
    %c0_i32_1 = arith.constant 0 : i32
    return %c0_i32, %c0_i32_0 : i32, i32
  }
  func.func @transform_3(%arg0: i32) -> (i32, i32) {
    %c0_i32 = arith.constant 0 : i32
    %c0_i32_0 = arith.constant 0 : i32
    %c0_i32_1 = arith.constant 0 : i32
    return %c0_i32, %c0_i32_0 : i32, i32
  }
  func.func @transform_4(%arg0: i32) -> (i32, i32) {
    %c0_i32 = arith.constant 0 : i32
    %c0_i32_0 = arith.constant 0 : i32
    %c0_i32_1 = arith.constant 0 : i32
    return %c0_i32, %c0_i32_0 : i32, i32
  }
  func.func @transform_5(%arg0: i32) -> (i32, i32) {
    %c0_i32 = arith.constant 0 : i32
    %c0_i32_0 = arith.constant 0 : i32
    return %arg0, %c0_i32 : i32, i32
  }
}

</mosaic_0001>

<bundles_post_ra>
// kernel: particle_encoder.1
= control target key start
LH: loop header
LB: loop body
LE: loop exit
PB: predicated region body
PF: predicated region fallthrough
CT: control target
= control target key end

     0   :  { %vm184_vm0 = vcmask 1045504   ;;  %vm69_vm1 = vcmask 244736   ;;  %vm1190_vm2 = vmmov 1   ;;  %vm797_vm4 = vcmask 523264   ;;  %s1671_s1 = inlined_call_operand.vmem [shape: f32[30,128], index: 1, kind: input, shape index: {}]   ;;  %s1672_s0 = inlined_call_operand.vmem [shape: f32[300,30], index: 0, kind: input, shape index: {}]   ;;  %s1673_s3 = inlined_call_operand.vmem [shape: f32[128,64], index: 3, kind: input, shape index: {}]   ;;  %s1674_s2 = inlined_call_operand.vmem [shape: f32[1,128], index: 2, kind: input, shape index: {}]   ;;  %s1675_s4 = inlined_call_operand.vmem [shape: f32[1,64], index: 4, kind: input, shape index: {}]   ;;  %s1676_s5 = inlined_call_operand.vmem [shape: f32[300,64], index: 5, kind: output, shape index: {}]  }
   0x1   :  { %v58_v0 = vld [vmem:[%s1671_s1] sm:$0xff]  ;;  %v59_v1 = vld [vmem:[%s1671_s1 + $0x8] sm:$0xff]  ;;  %v60_v2 = vld [vmem:[%s1671_s1 + $0x10] sm:$0xff] }
   0x2   :  { %v1131_v3 = vpack.c.bf16 %v59_v1, %v58_v0  ;;  %v61_v4 = vld [vmem:[%s1671_s1 + $0x18] sm:$0x3f]  ;;  %v20_v5 = vld [vmem:[%s1672_s0] sm:$0xff]  ;;  %vm1136_vm3 = vmpackc.low %vm184_vm0, %vm1190_vm2 }
   0x3   :  { %v1135_v6 = vpack.c.bf16 %v61_v4, %v60_v2  ;;  %985 = vmatprep.mubr.msk.f32.mxu0 %vm69_vm1, %v20_v5  ;;  %v21_v7 = vld [vmem:[%s1672_s0 + $0x8] sm:$0xff]  ;;  %v22_v8 = vld [vmem:[%s1672_s0 + $0x10] sm:$0xff]  ;;  %v23_v9 = vld [vmem:[%s1672_s0 + $0x18] sm:$0xff] }
   0x4   :  { %1132 = vmatprep.subr.bf16.mxu0 %v1131_v3  ;;  %v24_v10 = vld [vmem:[%s1672_s0 + $0x20] sm:$0xff]  ;;  %v482_v12 = vld [vmem:[%s1673_s3 + $0x8] sm:$0xff]  ;;  %v483_v14 = vld [vmem:[%s1673_s3 + $0x10] sm:$0xff] }
   0x5   :  { %1134 = vmatpush3.bf16.msra.mxu0 %v1131_v3  ;;  %v481_v11 = vld [vmem:[%s1673_s3] sm:$0xff]  ;;  %v484_v15 = vld [vmem:[%s1673_s3 + $0x18] sm:$0xff]  ;;  %v25_v16 = vld [vmem:[%s1672_s0 + $0x28] sm:$0xff] }
   0x6   :  { %1137 = vmatprep.subr.msk.bf16.mxu0 %vm1136_vm3, %v1135_v6  ;;  %v1141_v13 = vpack.c.bf16 %v482_v12, %v481_v11  ;;  %v1145_v17 = vpack.c.bf16 %v484_v15, %v483_v14  ;;  %v485_v18 = vld [vmem:[%s1673_s3 + $0x20] sm:$0xff]  ;;  %v486_v19 = vld [vmem:[%s1673_s3 + $0x28] sm:$0xff]  ;;  %v26_v20 = vld [vmem:[%s1672_s0 + $0x30] sm:$0xff] }
   0x7   :  { %v1149_v21 = vpack.c.bf16 %v486_v19, %v485_v18  ;;  %v27_v22 = vld [vmem:[%s1672_s0 + $0x38] sm:$0xff]  ;;  %v487_v23 = vld [vmem:[%s1673_s3 + $0x30] sm:$0xff]  ;;  %v28_v25 = vld [vmem:[%s1672_s0 + $0x40] sm:$0xff] }
   0x8   :  { %1173 = vmatprep.subr.bf16.mxu1 %v1141_v13  ;;  %v488_v24 = vld [vmem:[%s1673_s3 + $0x38] sm:$0xff]  ;;  %v29_v27 = vld [vmem:[%s1672_s0 + $0x48] sm:$0xff]  ;;  %v489_v28 = vld [vmem:[%s1673_s3 + $0x40] sm:$0xff] }
   0x9   :  { %1140 = vmatpush3.bf16.msk.msra.mxu0 %vm1136_vm3, %v1135_v6  ;;  %1181 = vmatpush3.bf16.msra.mxu1 %v1141_v13  ;;  %v1153_v26 = vpack.c.bf16 %v488_v24, %v487_v23  ;;  %v490_v29 = vld [vmem:[%s1673_s3 + $0x48] sm:$0xff]  ;;  %v30_v30 = vld [vmem:[%s1672_s0 + $0x50] sm:$0xff]  ;;  %v31_v32 = vld [vmem:[%s1672_s0 + $0x58] sm:$0xff] }
   0xa   :  { %1142 = vmatprep.subr.bf16.mxu0 %v1141_v13  ;;  %1174 = vmatprep.subr.bf16.mxu1 %v1145_v17  ;;  %v1157_v31 = vpack.c.bf16 %v490_v29, %v489_v28  ;;  %v491_v33 = vld [vmem:[%s1673_s3 + $0x50] sm:$0xff]  ;;  %v492_v34 = vld [vmem:[%s1673_s3 + $0x58] sm:$0xff]  ;;  %v32_v35 = vld [vmem:[%s1672_s0 + $0x60] sm:$0xff] }
   0xb   :  { %v1161_v36 = vpack.c.bf16 %v492_v34, %v491_v33  ;;  %v33_v37 = vld [vmem:[%s1672_s0 + $0x68] sm:$0xff]  ;;  %v493_v38 = vld [vmem:[%s1673_s3 + $0x60] sm:$0xff]  ;;  %v34_v40 = vld [vmem:[%s1672_s0 + $0x70] sm:$0xff] }
   0xc   :  { %986 = vmatmul.mubr.msk.f32.vlgmr.msra.gmra.mrb[0].mxu0 %vm69_vm1, %v21_v7  ;;  %v494_v39 = vld [vmem:[%s1673_s3 + $0x68] sm:$0xff]  ;;  %v35_v42 = vld [vmem:[%s1672_s0 + $0x78] sm:$0xff]  ;;  %v36_v43 = vld [vmem:[%s1672_s0 + $0x80] sm:$0xff] }
   0xd   :  { %988 = vmatprep.mubr.msk.f32.mxu0 %vm69_vm1, %v22_v8  ;;  %1144 = vmatpush3.bf16.msra.mxu0 %v1141_v13  ;;  %v1165_v41 = vpack.c.bf16 %v494_v39, %v493_v38  ;;  %v37_v44 = vld [vmem:[%s1672_s0 + $0x88] sm:$0xff]  ;;  %v38_v45 = vld [vmem:[%s1672_s0 + $0x90] sm:$0xff]  ;;  %v39_v46 = vld [vmem:[%s1672_s0 + $0x98] sm:$0xff] }
   0xe   :  { %1146 = vmatprep.subr.bf16.mxu0 %v1145_v17  ;;  %1182 = vmatpush3.bf16.msra.mxu1 %v1145_v17  ;;  %v40_v47 = vld [vmem:[%s1672_s0 + $0xa0] sm:$0xff]  ;;  %v41_v48 = vld [vmem:[%s1672_s0 + $0xa8] sm:$0xff]  ;;  %v42_v49 = vld [vmem:[%s1672_s0 + $0xb0] sm:$0xff] }
   0xf   :  { %1175 = vmatprep.subr.bf16.mxu1 %v1149_v21  ;;  %v43_v50 = vld [vmem:[%s1672_s0 + $0xb8] sm:$0xff]  ;;  %v44_v51 = vld [vmem:[%s1672_s0 + $0xc0] sm:$0xff]  ;;  %v45_v52 = vld [vmem:[%s1672_s0 + $0xc8] sm:$0xff] }
  0x10   :  { %989 = vmatmul.mubr.msk.f32.gmra.mrb[2].mxu0 %vm69_vm1, %v23_v9  ;;  %v46_v53 = vld [vmem:[%s1672_s0 + $0xd0] sm:$0xff]  ;;  %v47_v54 = vld [vmem:[%s1672_s0 + $0xd8] sm:$0xff]  ;;  %v48_v55 = vld [vmem:[%s1672_s0 + $0xe0] sm:$0xff] }
  0x11   :  { %991 = vmatprep.mubr.msk.f32.mxu0 %vm69_vm1, %v24_v10  ;;  %1148 = vmatpush3.bf16.msra.mxu0 %v1145_v17  ;;  %v49_v56 = vld [vmem:[%s1672_s0 + $0xe8] sm:$0xff]  ;;  %v50_v57 = vld [vmem:[%s1672_s0 + $0xf0] sm:$0xff]  ;;  %v51_v58 = vld [vmem:[%s1672_s0 + $0xf8] sm:$0xff] }
  0x12   :  { %1150 = vmatprep.subr.bf16.mxu0 %v1149_v21  ;;  %1183 = vmatpush3.bf16.msra.mxu1 %v1149_v21  ;;  %v52_v59 = vld [vmem:[%s1672_s0 + $0x100] sm:$0xff]  ;;  %v53_v60 = vld [vmem:[%s1672_s0 + $0x108] sm:$0xff]  ;;  %v54_v61 = vld [vmem:[%s1672_s0 + $0x110] sm:$0xff] }
  0x13   :  { %1176 = vmatprep.subr.bf16.mxu1 %v1153_v26  ;;  %v55_v62 = vld [vmem:[%s1672_s0 + $0x118] sm:$0xff]  ;;  %v56_v63 = vld [vmem:[%s1672_s0 + $0x120] sm:$0xff]  ;;  %v57_v0 = vld [vmem:[%s1672_s0 + $0x128] sm:$0xff] }
  0x14   :  { %992 = vmatmul.mubr.msk.f32.gmra.mrb[4].mxu0 %vm69_vm1, %v25_v16  ;;  %v495_v1 = vld [vmem:[%s1673_s3 + $0x70] sm:$0xff]  ;;  %v496_v2 = vld [vmem:[%s1673_s3 + $0x78] sm:$0xff]  ;;  %v1436_v4 = vld [vmem:[%s1674_s2] ss:$0 sm:$0xff] }
  0x15   :  { %994 = vmatprep.mubr.msk.f32.mxu0 %vm69_vm1, %v26_v20  ;;  %1152 = vmatpush3.bf16.msra.mxu0 %v1149_v21  ;;  %v1169_v3 = vpack.c.bf16 %v496_v2, %v495_v1 }
  0x16   :  { %1154 = vmatprep.subr.bf16.mxu0 %v1153_v26  ;;  %1184 = vmatpush3.bf16.msra.mxu1 %v1153_v26 }
  0x17   :  { %1177 = vmatprep.subr.bf16.mxu1 %v1157_v31 }
  0x18   :  { %995 = vmatmul.mubr.msk.f32.gmra.mrb[6].mxu0 %vm69_vm1, %v27_v22 }
  0x19   :  { %997 = vmatprep.mubr.msk.f32.mxu0 %vm69_vm1, %v28_v25  ;;  %1156 = vmatpush3.bf16.msra.mxu0 %v1153_v26 }
  0x1a   :  { %1158 = vmatprep.subr.bf16.mxu0 %v1157_v31  ;;  %1185 = vmatpush3.bf16.msra.mxu1 %v1157_v31 }
  0x1b   :  { %1178 = vmatprep.subr.bf16.mxu1 %v1161_v36 }
  0x1c   :  { %998 = vmatmul.mubr.msk.f32.gmra.mrb[8].mxu0 %vm69_vm1, %v29_v27 }
  0x1d   :  { %1000 = vmatprep.mubr.msk.f32.mxu0 %vm69_vm1, %v30_v30  ;;  %1160 = vmatpush3.bf16.msra.mxu0 %v1157_v31 }
  0x1e   :  { %1162 = vmatprep.subr.bf16.mxu0 %v1161_v36  ;;  %1186 = vmatpush3.bf16.msra.mxu1 %v1161_v36 }
  0x1f   :  { %1179 = vmatprep.subr.bf16.mxu1 %v1165_v41 }
  0x20   :  { %1001 = vmatmul.mubr.msk.f32.gmra.mrb[10].mxu0 %vm69_vm1, %v31_v32 }
  0x21   :  { %1003 = vmatprep.mubr.msk.f32.mxu0 %vm69_vm1, %v32_v35  ;;  %1164 = vmatpush3.bf16.msra.mxu0 %v1161_v36 }
  0x22   :  { %1166 = vmatprep.subr.bf16.mxu0 %v1165_v41  ;;  %1187 = vmatpush3.bf16.msra.mxu1 %v1165_v41 }
  0x23   :  { %1180 = vmatprep.subr.bf16.mxu1 %v1169_v3 }
  0x24   :  { %1004 = vmatmul.mubr.msk.f32.gmra.mrb[12].mxu0 %vm69_vm1, %v33_v37 }
  0x25   :  { %1006 = vmatprep.mubr.msk.f32.mxu0 %vm69_vm1, %v34_v40  ;;  %1168 = vmatpush3.bf16.msra.mxu0 %v1165_v41 }
  0x26   :  { %1170 = vmatprep.subr.bf16.mxu0 %v1169_v3  ;;  %1188 = vmatpush3.bf16.msra.mxu1 %v1169_v3 }
  0x28   :  { %1007 = vmatmul.mubr.msk.f32.gmra.mrb[14].mxu0 %vm69_vm1, %v35_v42 }
  0x29   :  { %1009 = vmatprep.mubr.msk.f32.mxu0 %vm69_vm1, %v36_v43  ;;  %1172 = vmatpush3.bf16.msra.mxu0 %v1169_v3 }
  0x2c   :  { %1010 = vmatmul.mubr.msk.f32.gmra.mrb[16].mxu0 %vm69_vm1, %v37_v44 }
  0x2d   :  { %1012 = vmatprep.mubr.msk.f32.mxu0 %vm69_vm1, %v38_v45 }
  0x30   :  { %1013 = vmatmul.mubr.msk.f32.gmra.mrb[18].mxu0 %vm69_vm1, %v39_v46 }
  0x31   :  { %1015 = vmatprep.mubr.msk.f32.mxu0 %vm69_vm1, %v40_v47 }
  0x34   :  { %1016 = vmatmul.mubr.msk.f32.gmra.mrb[20].mxu0 %vm69_vm1, %v41_v48 }
  0x35   :  { %1018 = vmatprep.mubr.msk.f32.mxu0 %vm69_vm1, %v42_v49 }
  0x38   :  { %1019 = vmatmul.mubr.msk.f32.gmra.mrb[22].mxu0 %vm69_vm1, %v43_v50 }
  0x39   :  { %1021 = vmatprep.mubr.msk.f32.mxu0 %vm69_vm1, %v44_v51 }
  0x3c   :  { %1022 = vmatmul.mubr.msk.f32.gmra.mrb[24].mxu0 %vm69_vm1, %v45_v52 }
  0x3d   :  { %1024 = vmatprep.mubr.msk.f32.mxu0 %vm69_vm1, %v46_v53 }
  0x40   :  { %1025 = vmatmul.mubr.msk.f32.gmra.mrb[26].mxu0 %vm69_vm1, %v47_v54 }
  0x41   :  { %1027 = vmatprep.mubr.msk.f32.mxu0 %vm69_vm1, %v48_v55 }
  0x44   :  { %1028 = vmatmul.mubr.msk.f32.gmra.mrb[28].mxu0 %vm69_vm1, %v49_v56 }
  0x45   :  { %1030 = vmatprep.mubr.msk.f32.mxu0 %vm69_vm1, %v50_v57 }
  0x48   :  { %1031 = vmatmul.mubr.msk.f32.gmra.mrb[30].mxu0 %vm69_vm1, %v51_v58 }
  0x49   :  { %1033 = vmatprep.mubr.msk.f32.mxu0 %vm69_vm1, %v52_v59 }
  0x4c   :  { %1034 = vmatmul.mubr.msk.f32.gmra.mrb[32].mxu0 %vm69_vm1, %v53_v60 }
  0x4d   :  { %1036 = vmatprep.mubr.msk.f32.mxu0 %vm69_vm1, %v54_v61 }
  0x50   :  { %1037 = vmatmul.mubr.msk.f32.gmra.mrb[34].mxu0 %vm69_vm1, %v55_v62 }
  0x51   :  { %1039 = vmatprep.mubr.msk.f32.mxu0 %vm69_vm1, %v56_v63 }
  0x54   :  { %1040 = vmatmul.mubr.msk.f32.gmra.mrb[36].mxu0 %vm69_vm1, %v57_v0 }
  0xdf   :  { %v987_v5 = vpop.f32.mrb[0].mxu0 }
  0xe0   :  { %v260_v6 = vadd.f32 %v987_v5, %v1436_v4  ;;  %v254_v7 = vpop.f32.mrb[1].mxu0 }
  0xe1   :  { %v255_v8 = vadd.f32 %v1436_v4, %v254_v7 }
  0xe2   :  { %v444_v11 = vmax.f32 %v260_v6, 0.0 }
  0xe3   :  { %v443_v9 = vmax.f32 %v255_v8, 0.0  ;;  %v990_v10 = vpop.f32.mrb[2].mxu0 }
  0xe4   :  { %v270_v12 = vadd.f32 %v990_v10, %v1436_v4  ;;  %v264_v13 = vpop.f32.mrb[3].mxu0 }
  0xe5   :  { %v265_v14 = vadd.f32 %v1436_v4, %v264_v13  ;;  %1074 = vmatprep.mubr.f32.mxu0 %v443_v9 }
  0xe6   :  { %1075 = vmatmul.mubr.f32.vlgmr.msra.gmra.mrb[38].mxu0 %v444_v11  ;;  %v446_v17 = vmax.f32 %v270_v12, 0.0 }
  0xe7   :  { %v445_v15 = vmax.f32 %v265_v14, 0.0  ;;  %v993_v16 = vpop.f32.mrb[4].mxu0 }
  0xe8   :  { %v280_v18 = vadd.f32 %v993_v16, %v1436_v4  ;;  %v274_v19 = vpop.f32.mrb[5].mxu0 }
  0xe9   :  { %v275_v20 = vadd.f32 %v1436_v4, %v274_v19  ;;  %1077 = vmatprep.mubr.f32.mxu0 %v445_v15 }
  0xea   :  { %1078 = vmatmul.mubr.f32.gmra.mrb[40].mxu0 %v446_v17  ;;  %v448_v23 = vmax.f32 %v280_v18, 0.0 }
  0xeb   :  { %v447_v21 = vmax.f32 %v275_v20, 0.0  ;;  %v996_v22 = vpop.f32.mrb[6].mxu0 }
  0xec   :  { %v290_v24 = vadd.f32 %v996_v22, %v1436_v4  ;;  %v284_v25 = vpop.f32.mrb[7].mxu0 }
  0xed   :  { %1080 = vmatprep.mubr.f32.mxu0 %v447_v21  ;;  %v285_v26 = vadd.f32 %v1436_v4, %v284_v25 }
  0xee   :  { %1081 = vmatmul.mubr.f32.gmra.mrb[42].mxu0 %v448_v23  ;;  %v450_v29 = vmax.f32 %v290_v24, 0.0 }
  0xef   :  { %v999_v27 = vpop.f32.mrb[8].mxu0  ;;  %v449_v28 = vmax.f32 %v285_v26, 0.0 }
  0xf0   :  { %v300_v30 = vadd.f32 %v999_v27, %v1436_v4  ;;  %v294_v31 = vpop.f32.mrb[9].mxu0 }
  0xf1   :  { %v295_v32 = vadd.f32 %v1436_v4, %v294_v31  ;;  %1083 = vmatprep.mubr.f32.mxu1 %v449_v28 }
  0xf2   :  { %1084 = vmatmul.mubr.f32.vlgmr.msra.gmra.mrb[0].mxu1 %v450_v29  ;;  %v452_v35 = vmax.f32 %v300_v30, 0.0 }
  0xf3   :  { %v451_v33 = vmax.f32 %v295_v32, 0.0  ;;  %v1002_v34 = vpop.f32.mrb[10].mxu0 }
  0xf4   :  { %v310_v36 = vadd.f32 %v1002_v34, %v1436_v4  ;;  %v304_v37 = vpop.f32.mrb[11].mxu0 }
  0xf5   :  { %v305_v38 = vadd.f32 %v1436_v4, %v304_v37  ;;  %1086 = vmatprep.mubr.f32.mxu1 %v451_v33 }
  0xf6   :  { %1087 = vmatmul.mubr.f32.gmra.mrb[2].mxu1 %v452_v35  ;;  %v454_v41 = vmax.f32 %v310_v36, 0.0 }
  0xf7   :  { %v453_v39 = vmax.f32 %v305_v38, 0.0  ;;  %v1005_v40 = vpop.f32.mrb[12].mxu0 }
  0xf8   :  { %v320_v42 = vadd.f32 %v1005_v40, %v1436_v4  ;;  %v314_v43 = vpop.f32.mrb[13].mxu0 }
  0xf9   :  { %v315_v44 = vadd.f32 %v1436_v4, %v314_v43  ;;  %1089 = vmatprep.mubr.f32.mxu1 %v453_v39 }
  0xfa   :  { %1090 = vmatmul.mubr.f32.gmra.mrb[4].mxu1 %v454_v41  ;;  %v456_v47 = vmax.f32 %v320_v42, 0.0 }
  0xfb   :  { %v455_v45 = vmax.f32 %v315_v44, 0.0  ;;  %v1008_v46 = vpop.f32.mrb[14].mxu0 }
  0xfc   :  { %v330_v48 = vadd.f32 %v1008_v46, %v1436_v4  ;;  %v324_v49 = vpop.f32.mrb[15].mxu0 }
  0xfd   :  { %v325_v50 = vadd.f32 %v1436_v4, %v324_v49  ;;  %1092 = vmatprep.mubr.f32.mxu1 %v455_v45 }
  0xfe   :  { %1093 = vmatmul.mubr.f32.gmra.mrb[6].mxu1 %v456_v47  ;;  %v458_v53 = vmax.f32 %v330_v48, 0.0 }
  0xff   :  { %v457_v51 = vmax.f32 %v325_v50, 0.0  ;;  %v1011_v52 = vpop.f32.mrb[16].mxu0 }
 0x100   :  { %v340_v54 = vadd.f32 %v1011_v52, %v1436_v4  ;;  %v334_v55 = vpop.f32.mrb[17].mxu0 }
 0x101   :  { %v335_v56 = vadd.f32 %v1436_v4, %v334_v55  ;;  %1095 = vmatprep.mubr.f32.mxu1 %v457_v51 }
 0x102   :  { %1096 = vmatmul.mubr.f32.gmra.mrb[8].mxu1 %v458_v53  ;;  %v460_v59 = vmax.f32 %v340_v54, 0.0 }
 0x103   :  { %v459_v57 = vmax.f32 %v335_v56, 0.0  ;;  %v1014_v58 = vpop.f32.mrb[18].mxu0  ;;  %v1479_v56 = vld [vmem:[%s1675_s4] ss:$0 sm:$0xff] }
 0x104   :  { %v350_v60 = vadd.f32 %v1014_v58, %v1436_v4  ;;  %v344_v61 = vpop.f32.mrb[19].mxu0 }
 0x105   :  { %v345_v62 = vadd.f32 %v1436_v4, %v344_v61  ;;  %1098 = vmatprep.mubr.f32.mxu1 %v459_v57 }
 0x106   :  { %1099 = vmatmul.mubr.f32.gmra.mrb[10].mxu1 %v460_v59  ;;  %v462_v1 = vmax.f32 %v350_v60, 0.0 }
 0x107   :  { %v461_v63 = vmax.f32 %v345_v62, 0.0  ;;  %v1017_v0 = vpop.f32.mrb[20].mxu0 }
 0x108   :  { %v360_v2 = vadd.f32 %v1017_v0, %v1436_v4  ;;  %v354_v3 = vpop.f32.mrb[21].mxu0 }
 0x109   :  { %v355_v5 = vadd.f32 %v1436_v4, %v354_v3  ;;  %1101 = vmatprep.mubr.f32.mxu1 %v461_v63 }
 0x10a   :  { %1102 = vmatmul.mubr.f32.gmra.mrb[12].mxu1 %v462_v1  ;;  %v464_v8 = vmax.f32 %v360_v2, 0.0 }
 0x10b   :  { %v463_v6 = vmax.f32 %v355_v5, 0.0  ;;  %v1020_v7 = vpop.f32.mrb[22].mxu0 }
 0x10c   :  { %v370_v9 = vadd.f32 %v1020_v7, %v1436_v4  ;;  %v364_v10 = vpop.f32.mrb[23].mxu0 }
 0x10d   :  { %v365_v11 = vadd.f32 %v1436_v4, %v364_v10  ;;  %1104 = vmatprep.mubr.f32.mxu1 %v463_v6 }
 0x10e   :  { %1105 = vmatmul.mubr.f32.gmra.mrb[14].mxu1 %v464_v8  ;;  %v466_v14 = vmax.f32 %v370_v9, 0.0 }
 0x10f   :  { %v465_v12 = vmax.f32 %v365_v11, 0.0  ;;  %v1023_v13 = vpop.f32.mrb[24].mxu0 }
 0x110   :  { %v380_v15 = vadd.f32 %v1023_v13, %v1436_v4  ;;  %v374_v16 = vpop.f32.mrb[25].mxu0 }
 0x111   :  { %v375_v17 = vadd.f32 %v1436_v4, %v374_v16  ;;  %1107 = vmatprep.mubr.f32.mxu1 %v465_v12 }
 0x112   :  { %1108 = vmatmul.mubr.f32.gmra.mrb[16].mxu1 %v466_v14  ;;  %v468_v20 = vmax.f32 %v380_v15, 0.0 }
 0x113   :  { %v467_v18 = vmax.f32 %v375_v17, 0.0  ;;  %v1026_v19 = vpop.f32.mrb[26].mxu0 }
 0x114   :  { %v390_v21 = vadd.f32 %v1026_v19, %v1436_v4  ;;  %v384_v22 = vpop.f32.mrb[27].mxu0 }
 0x115   :  { %v385_v23 = vadd.f32 %v1436_v4, %v384_v22  ;;  %1110 = vmatprep.mubr.f32.mxu1 %v467_v18 }
 0x116   :  { %1111 = vmatmul.mubr.f32.gmra.mrb[18].mxu1 %v468_v20  ;;  %v470_v26 = vmax.f32 %v390_v21, 0.0 }
 0x117   :  { %v469_v24 = vmax.f32 %v385_v23, 0.0  ;;  %v1029_v25 = vpop.f32.mrb[28].mxu0 }
 0x118   :  { %v400_v27 = vadd.f32 %v1029_v25, %v1436_v4  ;;  %v394_v28 = vpop.f32.mrb[29].mxu0 }
 0x119   :  { %v395_v29 = vadd.f32 %v1436_v4, %v394_v28  ;;  %1113 = vmatprep.mubr.f32.mxu1 %v469_v24 }
 0x11a   :  { %1114 = vmatmul.mubr.f32.gmra.mrb[20].mxu1 %v470_v26  ;;  %v472_v32 = vmax.f32 %v400_v27, 0.0 }
 0x11b   :  { %v471_v30 = vmax.f32 %v395_v29, 0.0  ;;  %v1032_v31 = vpop.f32.mrb[30].mxu0 }
 0x11c   :  { %v410_v33 = vadd.f32 %v1032_v31, %v1436_v4  ;;  %v404_v34 = vpop.f32.mrb[31].mxu0 }
 0x11d   :  { %v405_v35 = vadd.f32 %v1436_v4, %v404_v34  ;;  %1116 = vmatprep.mubr.f32.mxu1 %v471_v30 }
 0x11e   :  { %1117 = vmatmul.mubr.f32.gmra.mrb[22].mxu1 %v472_v32  ;;  %v474_v38 = vmax.f32 %v410_v33, 0.0 }
 0x11f   :  { %v473_v36 = vmax.f32 %v405_v35, 0.0  ;;  %v1035_v37 = vpop.f32.mrb[32].mxu0 }
 0x120   :  { %v420_v39 = vadd.f32 %v1035_v37, %v1436_v4  ;;  %v414_v40 = vpop.f32.mrb[33].mxu0 }
 0x121   :  { %v415_v41 = vadd.f32 %v1436_v4, %v414_v40  ;;  %1119 = vmatprep.mubr.f32.mxu1 %v473_v36 }
 0x122   :  { %1120 = vmatmul.mubr.f32.gmra.mrb[24].mxu1 %v474_v38  ;;  %v476_v44 = vmax.f32 %v420_v39, 0.0 }
 0x123   :  { %v475_v42 = vmax.f32 %v415_v41, 0.0  ;;  %v1038_v43 = vpop.f32.mrb[34].mxu0 }
 0x124   :  { %v430_v45 = vadd.f32 %v1038_v43, %v1436_v4  ;;  %v424_v46 = vpop.f32.mrb[35].mxu0 }
 0x125   :  { %v425_v47 = vadd.f32 %v1436_v4, %v424_v46  ;;  %1122 = vmatprep.mubr.f32.mxu1 %v475_v42 }
 0x126   :  { %1123 = vmatmul.mubr.f32.gmra.mrb[26].mxu1 %v476_v44  ;;  %v478_v50 = vmax.f32 %v430_v45, 0.0 }
 0x127   :  { %v477_v48 = vmax.f32 %v425_v47, 0.0  ;;  %v1041_v49 = vpop.f32.mrb[36].mxu0 }
 0x128   :  { %v440_v51 = vadd.f32 %v1041_v49, %v1436_v4  ;;  %v434_v52 = vpop.f32.mrb[37].mxu0 }
 0x129   :  { %v435_v53 = vadd.f32 %v1436_v4, %v434_v52  ;;  %1125 = vmatprep.mubr.f32.mxu1 %v477_v48 }
 0x12a   :  { %1126 = vmatmul.mubr.f32.gmra.mrb[28].mxu1 %v478_v50  ;;  %v480_v55 = vmax.f32 %v440_v51, 0.0 }
 0x12b   :  { %v479_v54 = vmax.f32 %v435_v53, 0.0 }
 0x12d   :  { %1128 = vmatprep.mubr.f32.mxu1 %v479_v54 }
 0x12e   :  { %1129 = vmatmul.mubr.f32.gmra.mrb[30].mxu1 %v480_v55 }
 0x1b9   :  { %v1076_v57 = vpop.f32.mrb[38].mxu0 }
 0x1ba   :  { %v576_v58 = vadd.f32 %v1076_v57, %v1479_v56  ;;  %v570_v59 = vpop.f32.mrb[39].mxu0 }
 0x1bb   :  { %v571_v60 = vadd.f32 %v1479_v56, %v570_v59 }
 0x1bc   :  { %v760_v61 = vmax.f32 %v576_v58, 0.0 }
 0x1bd   :  { %v759_v4 = vmax.f32 %v571_v60, 0.0  ;;  %v1079_v62 = vpop.f32.mrb[40].mxu0 }
 0x1be   :  { %799 = vst.msk [vmem:[%s1676_s5 + $0x8] sm:$0xff] %vm797_vm4, %v760_v61  ;;  %v586_v63 = vadd.f32 %v1079_v62, %v1479_v56  ;;  %v580_v0 = vpop.f32.mrb[41].mxu0 }
 0x1bf   :  { %798 = vst.msk [vmem:[%s1676_s5] sm:$0xff] %vm797_vm4, %v759_v4  ;;  %v581_v1 = vadd.f32 %v1479_v56, %v580_v0 }
 0x1c0   :  { %v762_v2 = vmax.f32 %v586_v63, 0.0 }
 0x1c1   :  { %v761_v3 = vmax.f32 %v581_v1, 0.0  ;;  %v1082_v5 = vpop.f32.mrb[42].mxu0 }
 0x1c2   :  { %801 = vst.msk [vmem:[%s1676_s5 + $0x18] sm:$0xff] %vm797_vm4, %v762_v2  ;;  %v596_v6 = vadd.f32 %v1082_v5, %v1479_v56  ;;  %v590_v7 = vpop.f32.mrb[43].mxu0 }
 0x1c3   :  { %800 = vst.msk [vmem:[%s1676_s5 + $0x10] sm:$0xff] %vm797_vm4, %v761_v3  ;;  %v591_v8 = vadd.f32 %v1479_v56, %v590_v7 }
 0x1c4   :  { %v764_v9 = vmax.f32 %v596_v6, 0.0 }
 0x1c5   :  { %v763_v10 = vmax.f32 %v591_v8, 0.0  ;;  %v1085_v11 = vpop.f32.mrb[0].mxu1 }
 0x1c6   :  { %803 = vst.msk [vmem:[%s1676_s5 + $0x28] sm:$0xff] %vm797_vm4, %v764_v9  ;;  %v606_v12 = vadd.f32 %v1085_v11, %v1479_v56  ;;  %v600_v13 = vpop.f32.mrb[1].mxu1 }
 0x1c7   :  { %802 = vst.msk [vmem:[%s1676_s5 + $0x20] sm:$0xff] %vm797_vm4, %v763_v10  ;;  %v601_v14 = vadd.f32 %v1479_v56, %v600_v13 }
 0x1c8   :  { %v766_v15 = vmax.f32 %v606_v12, 0.0 }
 0x1c9   :  { %v765_v16 = vmax.f32 %v601_v14, 0.0  ;;  %v1088_v17 = vpop.f32.mrb[2].mxu1 }
 0x1ca   :  { %805 = vst.msk [vmem:[%s1676_s5 + $0x38] sm:$0xff] %vm797_vm4, %v766_v15  ;;  %v616_v18 = vadd.f32 %v1088_v17, %v1479_v56  ;;  %v610_v19 = vpop.f32.mrb[3].mxu1 }
 0x1cb   :  { %804 = vst.msk [vmem:[%s1676_s5 + $0x30] sm:$0xff] %vm797_vm4, %v765_v16  ;;  %v611_v20 = vadd.f32 %v1479_v56, %v610_v19 }
 0x1cc   :  { %v768_v21 = vmax.f32 %v616_v18, 0.0 }
 0x1cd   :  { %v767_v22 = vmax.f32 %v611_v20, 0.0  ;;  %v1091_v23 = vpop.f32.mrb[4].mxu1 }
 0x1ce   :  { %807 = vst.msk [vmem:[%s1676_s5 + $0x48] sm:$0xff] %vm797_vm4, %v768_v21  ;;  %v626_v24 = vadd.f32 %v1091_v23, %v1479_v56  ;;  %v620_v25 = vpop.f32.mrb[5].mxu1 }
 0x1cf   :  { %806 = vst.msk [vmem:[%s1676_s5 + $0x40] sm:$0xff] %vm797_vm4, %v767_v22  ;;  %v621_v26 = vadd.f32 %v1479_v56, %v620_v25 }
 0x1d0   :  { %v770_v27 = vmax.f32 %v626_v24, 0.0 }
 0x1d1   :  { %v769_v28 = vmax.f32 %v621_v26, 0.0  ;;  %v1094_v29 = vpop.f32.mrb[6].mxu1 }
 0x1d2   :  { %809 = vst.msk [vmem:[%s1676_s5 + $0x58] sm:$0xff] %vm797_vm4, %v770_v27  ;;  %v636_v30 = vadd.f32 %v1094_v29, %v1479_v56  ;;  %v630_v31 = vpop.f32.mrb[7].mxu1 }
 0x1d3   :  { %808 = vst.msk [vmem:[%s1676_s5 + $0x50] sm:$0xff] %vm797_vm4, %v769_v28  ;;  %v631_v32 = vadd.f32 %v1479_v56, %v630_v31 }
 0x1d4   :  { %v772_v33 = vmax.f32 %v636_v30, 0.0 }
 0x1d5   :  { %v771_v34 = vmax.f32 %v631_v32, 0.0  ;;  %v1097_v35 = vpop.f32.mrb[8].mxu1 }
 0x1d6   :  { %811 = vst.msk [vmem:[%s1676_s5 + $0x68] sm:$0xff] %vm797_vm4, %v772_v33  ;;  %v646_v36 = vadd.f32 %v1097_v35, %v1479_v56  ;;  %v640_v37 = vpop.f32.mrb[9].mxu1 }
 0x1d7   :  { %810 = vst.msk [vmem:[%s1676_s5 + $0x60] sm:$0xff] %vm797_vm4, %v771_v34  ;;  %v641_v38 = vadd.f32 %v1479_v56, %v640_v37 }
 0x1d8   :  { %v774_v39 = vmax.f32 %v646_v36, 0.0 }
 0x1d9   :  { %v773_v40 = vmax.f32 %v641_v38, 0.0  ;;  %v1100_v41 = vpop.f32.mrb[10].mxu1 }
 0x1da   :  { %813 = vst.msk [vmem:[%s1676_s5 + $0x78] sm:$0xff] %vm797_vm4, %v774_v39  ;;  %v656_v42 = vadd.f32 %v1100_v41, %v1479_v56  ;;  %v650_v43 = vpop.f32.mrb[11].mxu1 }
 0x1db   :  { %812 = vst.msk [vmem:[%s1676_s5 + $0x70] sm:$0xff] %vm797_vm4, %v773_v40  ;;  %v651_v44 = vadd.f32 %v1479_v56, %v650_v43 }
 0x1dc   :  { %v776_v45 = vmax.f32 %v656_v42, 0.0 }
 0x1dd   :  { %v775_v46 = vmax.f32 %v651_v44, 0.0  ;;  %v1103_v47 = vpop.f32.mrb[12].mxu1 }
 0x1de   :  { %815 = vst.msk [vmem:[%s1676_s5 + $0x88] sm:$0xff] %vm797_vm4, %v776_v45  ;;  %v666_v48 = vadd.f32 %v1103_v47, %v1479_v56  ;;  %v660_v49 = vpop.f32.mrb[13].mxu1 }
 0x1df   :  { %814 = vst.msk [vmem:[%s1676_s5 + $0x80] sm:$0xff] %vm797_vm4, %v775_v46  ;;  %v661_v50 = vadd.f32 %v1479_v56, %v660_v49 }
 0x1e0   :  { %v778_v51 = vmax.f32 %v666_v48, 0.0 }
 0x1e1   :  { %v777_v52 = vmax.f32 %v661_v50, 0.0  ;;  %v1106_v53 = vpop.f32.mrb[14].mxu1 }
 0x1e2   :  { %817 = vst.msk [vmem:[%s1676_s5 + $0x98] sm:$0xff] %vm797_vm4, %v778_v51  ;;  %v676_v54 = vadd.f32 %v1106_v53, %v1479_v56  ;;  %v670_v55 = vpop.f32.mrb[15].mxu1 }
 0x1e3   :  { %816 = vst.msk [vmem:[%s1676_s5 + $0x90] sm:$0xff] %vm797_vm4, %v777_v52  ;;  %v671_v57 = vadd.f32 %v1479_v56, %v670_v55 }
 0x1e4   :  { %v780_v58 = vmax.f32 %v676_v54, 0.0 }
 0x1e5   :  { %v779_v59 = vmax.f32 %v671_v57, 0.0  ;;  %v1109_v60 = vpop.f32.mrb[16].mxu1 }
 0x1e6   :  { %819 = vst.msk [vmem:[%s1676_s5 + $0xa8] sm:$0xff] %vm797_vm4, %v780_v58  ;;  %v686_v61 = vadd.f32 %v1109_v60, %v1479_v56  ;;  %v680_v4 = vpop.f32.mrb[17].mxu1 }
 0x1e7   :  { %818 = vst.msk [vmem:[%s1676_s5 + $0xa0] sm:$0xff] %vm797_vm4, %v779_v59  ;;  %v681_v62 = vadd.f32 %v1479_v56, %v680_v4 }
 0x1e8   :  { %v782_v63 = vmax.f32 %v686_v61, 0.0 }
 0x1e9   :  { %v781_v0 = vmax.f32 %v681_v62, 0.0  ;;  %v1112_v1 = vpop.f32.mrb[18].mxu1 }
 0x1ea   :  { %821 = vst.msk [vmem:[%s1676_s5 + $0xb8] sm:$0xff] %vm797_vm4, %v782_v63  ;;  %v696_v2 = vadd.f32 %v1112_v1, %v1479_v56  ;;  %v690_v3 = vpop.f32.mrb[19].mxu1 }
 0x1eb   :  { %820 = vst.msk [vmem:[%s1676_s5 + $0xb0] sm:$0xff] %vm797_vm4, %v781_v0  ;;  %v691_v5 = vadd.f32 %v1479_v56, %v690_v3 }
 0x1ec   :  { %v784_v6 = vmax.f32 %v696_v2, 0.0 }
 0x1ed   :  { %v783_v7 = vmax.f32 %v691_v5, 0.0  ;;  %v1115_v8 = vpop.f32.mrb[20].mxu1 }
 0x1ee   :  { %823 = vst.msk [vmem:[%s1676_s5 + $0xc8] sm:$0xff] %vm797_vm4, %v784_v6  ;;  %v706_v9 = vadd.f32 %v1115_v8, %v1479_v56  ;;  %v700_v10 = vpop.f32.mrb[21].mxu1 }
 0x1ef   :  { %822 = vst.msk [vmem:[%s1676_s5 + $0xc0] sm:$0xff] %vm797_vm4, %v783_v7  ;;  %v701_v11 = vadd.f32 %v1479_v56, %v700_v10 }
 0x1f0   :  { %v786_v12 = vmax.f32 %v706_v9, 0.0 }
 0x1f1   :  { %v785_v13 = vmax.f32 %v701_v11, 0.0  ;;  %v1118_v14 = vpop.f32.mrb[22].mxu1 }
 0x1f2   :  { %825 = vst.msk [vmem:[%s1676_s5 + $0xd8] sm:$0xff] %vm797_vm4, %v786_v12  ;;  %v716_v15 = vadd.f32 %v1118_v14, %v1479_v56  ;;  %v710_v16 = vpop.f32.mrb[23].mxu1 }
 0x1f3   :  { %824 = vst.msk [vmem:[%s1676_s5 + $0xd0] sm:$0xff] %vm797_vm4, %v785_v13  ;;  %v711_v17 = vadd.f32 %v1479_v56, %v710_v16 }
 0x1f4   :  { %v788_v18 = vmax.f32 %v716_v15, 0.0 }
 0x1f5   :  { %v787_v19 = vmax.f32 %v711_v17, 0.0  ;;  %v1121_v20 = vpop.f32.mrb[24].mxu1 }
 0x1f6   :  { %827 = vst.msk [vmem:[%s1676_s5 + $0xe8] sm:$0xff] %vm797_vm4, %v788_v18  ;;  %v726_v21 = vadd.f32 %v1121_v20, %v1479_v56  ;;  %v720_v22 = vpop.f32.mrb[25].mxu1 }
 0x1f7   :  { %826 = vst.msk [vmem:[%s1676_s5 + $0xe0] sm:$0xff] %vm797_vm4, %v787_v19  ;;  %v721_v23 = vadd.f32 %v1479_v56, %v720_v22 }
 0x1f8   :  { %v790_v24 = vmax.f32 %v726_v21, 0.0 }
 0x1f9   :  { %v789_v25 = vmax.f32 %v721_v23, 0.0  ;;  %v1124_v26 = vpop.f32.mrb[26].mxu1 }
 0x1fa   :  { %829 = vst.msk [vmem:[%s1676_s5 + $0xf8] sm:$0xff] %vm797_vm4, %v790_v24  ;;  %v736_v27 = vadd.f32 %v1124_v26, %v1479_v56  ;;  %v730_v28 = vpop.f32.mrb[27].mxu1 }
 0x1fb   :  { %828 = vst.msk [vmem:[%s1676_s5 + $0xf0] sm:$0xff] %vm797_vm4, %v789_v25  ;;  %v731_v29 = vadd.f32 %v1479_v56, %v730_v28 }
 0x1fc   :  { %v792_v30 = vmax.f32 %v736_v27, 0.0 }
 0x1fd   :  { %v791_v31 = vmax.f32 %v731_v29, 0.0  ;;  %v1127_v32 = vpop.f32.mrb[28].mxu1 }
 0x1fe   :  { %831 = vst.msk [vmem:[%s1676_s5 + $0x108] sm:$0xff] %vm797_vm4, %v792_v30  ;;  %v746_v33 = vadd.f32 %v1127_v32, %v1479_v56  ;;  %v740_v34 = vpop.f32.mrb[29].mxu1 }
 0x1ff   :  { %830 = vst.msk [vmem:[%s1676_s5 + $0x100] sm:$0xff] %vm797_vm4, %v791_v31  ;;  %v741_v35 = vadd.f32 %v1479_v56, %v740_v34 }
 0x200   :  { %v794_v36 = vmax.f32 %v746_v33, 0.0 }
 0x201   :  { %v793_v37 = vmax.f32 %v741_v35, 0.0  ;;  %v1130_v38 = vpop.f32.mrb[30].mxu1 }
 0x202   :  { %833 = vst.msk [vmem:[%s1676_s5 + $0x118] sm:$0xff] %vm797_vm4, %v794_v36  ;;  %v756_v39 = vadd.f32 %v1130_v38, %v1479_v56  ;;  %v750_v40 = vpop.f32.mrb[31].mxu1 }
 0x203   :  { %832 = vst.msk [vmem:[%s1676_s5 + $0x110] sm:$0xff] %vm797_vm4, %v793_v37  ;;  %v751_v41 = vadd.f32 %v1479_v56, %v750_v40 }
 0x204   :  { %v796_v42 = vmax.f32 %v756_v39, 0.0 }
 0x205   :  { %v795_v43 = vmax.f32 %v751_v41, 0.0 }
 0x206   :  { %835 = vst.msk [vmem:[%s1676_s5 + $0x128] sm:$0xff] %vm797_vm4, %v796_v42 }
 0x207   :  { %834 = vst.msk [vmem:[%s1676_s5 + $0x120] sm:$0xff] %vm797_vm4, %v795_v43 }

</bundles_post_ra>
